<compile_context>
chip_gen: v5e
topology: v5e:2x2
jax: 0.10.0
libtpu: 0.0.40
codegen_flags: <defaults>
</compile_context>

<pallas_src>
import functools

import jax
import jax.numpy as jnp
from jax import lax
from jax.experimental import pallas as pl
from jax.experimental.pallas import tpu as pltpu


def _round_up(a: int, b: int) -> int:
    return (a + b - 1) // b * b


def _cdiv(a: int, b: int) -> int:
    return (a + b - 1) // b


# ---------------------------------------------------------------------------
# Kernel 1: small vocab -> table resident in VMEM, gather done as a one-hot
# matmul on the otherwise-idle MXU.
# Grid = (n_model_tiles [outer, arbitrary], token_tiles [inner, parallel]).
# ---------------------------------------------------------------------------
def _embed_onehot_kernel(ids_ref, tok_table_ref, pos_ref, out_ref):
    # ids_ref       : (TQ, 1)        int32
    # tok_table_ref : (n_vocab, TN)  resident table column-slice (Buffered(1))
    # pos_ref       : (TQ, TN)
    # out_ref       : (TQ, TN)
    ids = ids_ref[...]                                         # (TQ, 1)
    tq = ids.shape[0]
    n_vocab = tok_table_ref.shape[0]

    col_ids = lax.broadcasted_iota(jnp.int32, (tq, n_vocab), 1)
    onehot = (col_ids == ids).astype(tok_table_ref.dtype)      # (TQ, n_vocab)
    tok_rows = jnp.dot(onehot, tok_table_ref[...],
                       preferred_element_type=jnp.float32)     # (TQ, TN)

    out_ref[...] = (tok_rows + pos_ref[...].astype(jnp.float32)).astype(out_ref.dtype)


# ---------------------------------------------------------------------------
# Kernel 2: large vocab -> table stays in HBM; per-token rows are gathered with
# multi-outstanding DMAs driven by scalar-prefetched ids in SMEM.
# ---------------------------------------------------------------------------
def _embed_dma_kernel(ids_ref, tok_hbm_ref, pos_ref, out_ref, row_buf, sem):
    # ids_ref     : (seq_pad,) int32  (SMEM scalar prefetch)
    # tok_hbm_ref : (n_vocab, n_model) in HBM (pl.ANY)
    # pos_ref     : (TQ, n_model) VMEM
    # out_ref     : (TQ, n_model) VMEM
    # row_buf     : (TQ, n_model) VMEM scratch
    # sem         : (1,) DMA semaphore shared by all outstanding row copies
    tq = out_ref.shape[0]
    base = pl.program_id(0) * tq

    def _start(t, carry):
        tok_id = ids_ref[base + t]
        pltpu.make_async_copy(tok_hbm_ref.at[tok_id], row_buf.at[t],
                              sem.at[0]).start()
        return carry

    lax.fori_loop(0, tq, _start, 0)

    def _wait(t, carry):
        # All copies share one semaphore; each wait retires one row's bytes, so
        # after TQ waits every row has landed.
        pltpu.make_async_copy(tok_hbm_ref.at[0], row_buf.at[t], sem.at[0]).wait()
        return carry

    lax.fori_loop(0, tq, _wait, 0)

    out_ref[...] = (row_buf[...].astype(jnp.float32)
                    + pos_ref[...].astype(jnp.float32)).astype(out_ref.dtype)


_VMEM_TILE_BUDGET = 20 * 1024 * 1024   # conservative: fits v5e/v6e/v7x scoped limits


def _pick_tiles(seq, n_vocab, n_model, itemsize, tq_max, use_onehot):
    # Column tile: only split n_model when it is large and 128-divisible so
    # tiles stay lane-dense (unmasked stores); otherwise use the full width
    # (full-array dims are exempt from the (8,128) rule).
    tn = n_model
    if n_model > 2048 and n_model % 128 == 0:
        for cand in (2048, 1024, 512, 256, 128):
            if n_model % cand == 0:
                tn = cand
                break

    # Token tile: large enough to amortize the ~0.35us/step overhead, but keep
    # >= 2 grid steps (v7x megacore) and respect the VMEM budget.
    tq = min(tq_max, _round_up(seq, 8))
    if seq > 8 and _cdiv(seq, tq) < 2:
        tq = max(8, _round_up(_cdiv(seq, 2), 8))

    def vmem_bytes(tq_):
        tiles = 2 * 2 * tq_ * tn * 4                 # pos + out, double-buffered
        if use_onehot:
            gather = tq_ * n_vocab * 8               # iota + one-hot intermediates
            table = n_vocab * tn * itemsize          # resident, Buffered(1)
        else:
            gather = tq_ * n_model * itemsize        # row_buf scratch
            table = 0                                # table stays in HBM
        return tiles + gather + table + 2 * tq_ * 4  # + double-buffered ids

    while tq > 8 and vmem_bytes(tq) > _VMEM_TILE_BUDGET:
        tq = max(8, _round_up(tq // 2, 8))

    return tq, tn


@functools.partial(jax.jit, static_argnames=("tq_max", "onehot_vocab_limit"))
def embedding_forward(token_ids, embed_table, pos_table, *,
                      tq_max: int = 1024, onehot_vocab_limit: int = 1024):
    """token_ids: (seq,) int; embed_table: (n_vocab, n_model); pos_table: (max_pos, n_model).

    Returns embed_table[token_ids] + pos_table[arange(seq)], shape (seq, n_model).
    """
    seq = token_ids.shape[0]
    n_vocab, n_model = embed_table.shape
    max_pos = pos_table.shape[0]
    if seq > max_pos:
        raise ValueError(f"seq={seq} exceeds positional table size {max_pos}")

    dtype = embed_table.dtype
    itemsize = dtype.itemsize
    use_onehot = n_vocab <= onehot_vocab_limit
    tq, tn = _pick_tiles(seq, n_vocab, n_model, itemsize, tq_max, use_onehot)
    seq_pad = _round_up(seq, tq)

    # Positional rows: index pos_table in place whenever the grid stays in
    # bounds; only pad in the rare corner where seq_pad overruns the table.
    if seq_pad <= max_pos:
        pos_in = pos_table
    else:
        pos_in = jnp.zeros((seq_pad, n_model), pos_table.dtype).at[:max_pos].set(pos_table)

    # TODO(synk): out-of-range token ids silently produce a zero row (one-hot
    # path) rather than raising like torch.nn.Embedding; add pl.debug_check if
    # ids are not guaranteed valid.
    ids = token_ids.astype(jnp.int32)
    if seq_pad != seq:
        ids = jnp.pad(ids, (0, seq_pad - seq))       # pad ids are 0 (a valid row)

    grid_tokens = seq_pad // tq
    out_shape = jax.ShapeDtypeStruct((seq_pad, n_model), dtype)
    vmem_limit = 32 * 1024 * 1024

    if use_onehot:
        ids2d = ids.reshape(seq_pad, 1)
        grid = (n_model // tn, grid_tokens)          # n_model axis OUTER
        out = pl.pallas_call(
            _embed_onehot_kernel,
            out_shape=out_shape,
            grid_spec=pltpu.PrefetchScalarGridSpec(
                num_scalar_prefetch=0,
                grid=grid,
                in_specs=[
                    # token ids for this batch of TQ tokens
                    pl.BlockSpec((tq, 1), lambda j, i: (i, 0)),
                    # table column-slice, resident across the token axis;
                    # single-buffered since it is never re-fetched within a j.
                    pl.BlockSpec((n_vocab, tn), lambda j, i: (0, j),
                                 pipeline_mode=pl.Buffered(1)),
                    # positional rows, read directly from pos_table
                    pl.BlockSpec((tq, tn), lambda j, i: (i, j)),
                ],
                out_specs=pl.BlockSpec((tq, tn), lambda j, i: (i, j)),
            ),
            compiler_params=pltpu.CompilerParams(
                dimension_semantics=("arbitrary", "parallel"),
                vmem_limit_bytes=vmem_limit),
        )(ids2d, embed_table, pos_in)
    else:
        out = pl.pallas_call(
            _embed_dma_kernel,
            out_shape=out_shape,
            grid_spec=pltpu.PrefetchScalarGridSpec(
                num_scalar_prefetch=1,               # token ids -> SMEM
                grid=(grid_tokens,),
                in_specs=[
                    pl.BlockSpec(memory_space=pl.ANY),                    # table in HBM
                    pl.BlockSpec((tq, n_model), lambda i, ids_ref: (i, 0)),
                ],
                out_specs=pl.BlockSpec((tq, n_model), lambda i, ids_ref: (i, 0)),
                scratch_shapes=[
                    pltpu.VMEM((tq, n_model), dtype),
                    pltpu.SemaphoreType.DMA((1,)),
                ],
            ),
            compiler_params=pltpu.CompilerParams(
                dimension_semantics=("parallel",),
                vmem_limit_bytes=vmem_limit),
        )(ids, embed_table, pos_in)

    # Only slice when rows were actually padded (slicing is an extra HBM copy).
    return out if seq_pad == seq else out[:seq]


if __name__ == "__main__":
    key = jax.random.PRNGKey(0)
    k_tok, k_emb, k_pos, k_tok2, k_emb2 = jax.random.split(key, 5)

    # --- Test 1: TransConfig-sized (n_vocab=100, n_model=128, seq=8) --------
    n_vocab, n_model, max_pos, seq = 100, 128, 512, 8
    embed_table = jax.random.normal(k_emb, (n_vocab, n_model), dtype=jnp.float32)
    pos_table = jax.random.normal(k_pos, (max_pos, n_model), dtype=jnp.float32)
    token_ids = jax.random.randint(k_tok, (seq,), 0, n_vocab, dtype=jnp.int32)

    out = jax.block_until_ready(embedding_forward(token_ids, embed_table, pos_table))
    ref = embed_table[token_ids] + pos_table[jnp.arange(seq)]
    assert out.shape == (seq, n_model)
    assert jnp.allclose(out, ref, atol=1e-5), "one-hot path mismatch vs reference"

    # --- Test 2: larger vocab -> exercises the HBM DMA-gather path ----------
    n_vocab2, seq2 = 2048, 40
    embed_table2 = jax.random.normal(k_emb2, (n_vocab2, n_model), dtype=jnp.float32)
    token_ids2 = jax.random.randint(k_tok2, (seq2,), 0, n_vocab2, dtype=jnp.int32)

    out2 = jax.block_until_ready(embedding_forward(token_ids2, embed_table2, pos_table))
    ref2 = embed_table2[token_ids2] + pos_table[jnp.arange(seq2)]
    assert out2.shape == (seq2, n_model)
    assert jnp.allclose(out2, ref2, atol=1e-5), "DMA-gather path mismatch vs reference"

    print("KERNEL_OK")
</pallas_src>

<mosaic_0001>
module attributes {stable_mosaic.version = 11 : i64} {
  func.func @_embed_onehot_kernel(%arg0: i32, %arg1: i32, %arg2: memref<8x1xi32, #tpu.memory_space<vmem>>, %arg3: memref<100x128xf32, #tpu.memory_space<vmem>>, %arg4: memref<8x128xf32, #tpu.memory_space<vmem>>, %arg5: memref<8x128xf32, #tpu.memory_space<vmem>>) attributes {dimension_semantics = [#tpu.dimension_semantics<arbitrary>, #tpu.dimension_semantics<parallel>], iteration_bounds = array<i64: 1, 1>, scalar_prefetch = 0 : i64, scratch_operands = 0 : i64, tpu.core_type = #tpu.core_type<tc>, window_params = [{transform_indices = @transform_0, window_bounds = array<i64: 8, 1>}, {pipeline_mode = #tpu.pipeline_mode<synchronous>, transform_indices = @transform_1, window_bounds = array<i64: 100, 128>}, {transform_indices = @transform_2, window_bounds = array<i64: 8, 128>}, {transform_indices = @transform_3, window_bounds = array<i64: 8, 128>}]} {
    %c0 = arith.constant 0 : index
    %c0_0 = arith.constant 0 : index
    %0 = vector.load %arg2[%c0, %c0_0] : memref<8x1xi32, #tpu.memory_space<vmem>>, vector<8x1xi32>
    %1 = tpu.iota {dimensions = array<i32: 1>} : vector<8x100xi32>
    %2 = vector.broadcast %0 : vector<8x1xi32> to vector<8x100xi32>
    %3 = arith.cmpi eq, %1, %2 : vector<8x100xi32>
    %4 = arith.extui %3 : vector<8x100xi1> to vector<8x100xi32>
    %5 = arith.sitofp %4 : vector<8x100xi32> to vector<8x100xf32>
    %c0_1 = arith.constant 0 : index
    %c0_2 = arith.constant 0 : index
    %6 = vector.load %arg3[%c0_1, %c0_2] : memref<100x128xf32, #tpu.memory_space<vmem>>, vector<100x128xf32>
    %cst = arith.constant dense<0.000000e+00> : vector<8x128xf32>
    %7 = tpu.matmul %5, %6, %cst {dimension_numbers = #tpu.dot_dimension_numbers<[1], [0], [0], [1], [0, 0, 1, 1], [], []>} : vector<8x100xf32>, vector<100x128xf32>, vector<8x128xf32> -> vector<8x128xf32>
    %c0_3 = arith.constant 0 : index
    %c0_4 = arith.constant 0 : index
    %8 = vector.load %arg4[%c0_3, %c0_4] : memref<8x128xf32, #tpu.memory_space<vmem>>, vector<8x128xf32>
    %9 = arith.addf %7, %8 : vector<8x128xf32>
    %c0_5 = arith.constant 0 : index
    %c0_6 = arith.constant 0 : index
    %10 = vector.load %arg5[%c0_5, %c0_6] : memref<8x128xf32, #tpu.memory_space<vmem>>, vector<8x128xf32>
    tpu.vector_store %arg5[%c0_5, %c0_6], %9 {strides = array<i32>} : memref<8x128xf32, #tpu.memory_space<vmem>>, vector<8x128xf32>,
    return
  }
  func.func @transform_0(%arg0: i32, %arg1: i32) -> (i32, i32) {
    %c0_i32 = arith.constant 0 : i32
    %c0_i32_0 = arith.constant 0 : i32
    return %arg1, %c0_i32 : i32, i32
  }
  func.func @transform_1(%arg0: i32, %arg1: i32) -> (i32, i32) {
    %c0_i32 = arith.constant 0 : i32
    %c0_i32_0 = arith.constant 0 : i32
    return %c0_i32, %arg0 : i32, i32
  }
  func.func @transform_2(%arg0: i32, %arg1: i32) -> (i32, i32) {
    %c0_i32 = arith.constant 0 : i32
    return %arg1, %arg0 : i32, i32
  }
  func.func @transform_3(%arg0: i32, %arg1: i32) -> (i32, i32) {
    %c0_i32 = arith.constant 0 : i32
    return %arg1, %arg0 : i32, i32
  }
}

</mosaic_0001>

<bundles_post_ra>
// kernel: embedding_forward.1
= control target key start
LH: loop header
LB: loop body
LE: loop exit
PB: predicated region body
PF: predicated region fallthrough
CT: control target
= control target key end

     0   :  { %8 = vsyncpa [#allocation3], 0  ;;  %s243_s0 = inlined_call_operand.vmem [shape: s32[8,1], index: 0, kind: input, shape index: {}]   ;;  %s244_s1 = inlined_call_operand.hbm [shape: f32[100,128], index: 1, kind: input, shape index: {}]   ;;  %s245_s2 = inlined_call_operand.hbm [shape: f32[512,128], index: 2, kind: input, shape index: {}]   ;;  %s246_s3 = inlined_call_operand.hbm [shape: f32[8,128], index: 3, kind: output, shape index: {}]  }
   0x1   :  { %9 = vsyncpa [#allocation6], 0 }
   0x2   :  { %10 = vsyncpa [#allocation4], 0  ;;  %s17_s14 = sshll.u32 %s244_s1, 4  ;;  %s204_s15 = smov [#allocation2]   ;;  %s18_s14 = int_to_ptr.hbm [resolvable:$true] %s17_s14 }
   0x3   :  { %s19_s16 = sshll.u32 %s204_s15, 4  ;;  %s31_s19 = sshll.u32 %s245_s2, 4  ;;  %s20_s16 = int_to_ptr.vmem [resolvable:$true] %s19_s16  ;;  %s32_s19 = int_to_ptr.hbm [resolvable:$true] %s31_s19 }
   0x4   :  { %s205_s20 = smov 128   ;;  %s206_s21 = smov 8  }
   0x5   :  { %25 = dma.hbm_to_vmem [thread:$0]  %s18_s14, 1664, %s20_s16, [#allocation3], %s205_s20, %s205_s20, %s206_s21  }
   0x6   :  { %s207_s22 = smov [#allocation5]  }
   0x7   :  { %s33_s23 = sshll.u32 %s207_s22, 4  ;;  %s34_s23 = int_to_ptr.vmem [resolvable:$true] %s33_s23 }
   0x8   :  { %36 = dma.hbm_to_vmem [thread:$0]  %s32_s19, 128, %s34_s23, [#allocation6]  }
   0x9   :  { %198 = dma.done.wait [#allocation3], 1664  }
   0xa   :  { %199 = vsyncadd [#allocation3], 4294965632 }
   0xb   :  { %200 = dma.done.wait [#allocation6], 128  }
   0xc   :  { %201 = vsyncadd [#allocation6], 4294967168  ;;  %v208_v0 = vmov 0   ;;  %vm72_vm0 = vcmask 1043456   ;;  %v45_v1 = vld [vmem:[%s243_s0] sm:$0xff]  ;;  %v65_v3 = vld [vmem:[#allocation2 + $0x58] sm:$0xff]  ;;  %v46_v15 = vlaneseq }
   0xd   :  { %125 = vset.pattern.permute.xlu0 %v208_v0  ;;  %v66_v2 = vld [vmem:[#allocation2 + $0x60] sm:$0xf]  ;;  %v64_v4 = vld [vmem:[#allocation2 + $0x50] sm:$0xff]  ;;  %v63_v5 = vld [vmem:[#allocation2 + $0x48] sm:$0xff]  ;;  %vm68_vm1 = vcmask 818176   ;;  %v209_v18 = vmov 0.0  }
   0xe   :  { %49 = vperm.xlu0 %125, %v45_v1   ;;  %116 = vmatpush.msk.msra.mxu0 %vm72_vm0, %v66_v2  ;;  %v62_v6 = vld [vmem:[#allocation2 + $0x40] sm:$0xff]  ;;  %v61_v7 = vld [vmem:[#allocation2 + $0x38] sm:$0xff]  ;;  %v60_v8 = vld [vmem:[#allocation2 + $0x30] sm:$0xff]  ;;  %v47_v16 = vand.u32 127, %v46_v15  ;;  %s210_s0 = smov [#allocation7]   ;;  %s104_s27 = sshll.u32 %s246_s3, 4  ;;  %s105_s27 = int_to_ptr.hbm [resolvable:$true] %s104_s27 }
   0xf   :  { %v59_v9 = vld [vmem:[#allocation2 + $0x28] sm:$0xff]  ;;  %v58_v10 = vld [vmem:[#allocation2 + $0x20] sm:$0xff]  ;;  %v57_v11 = vld [vmem:[#allocation2 + $0x18] sm:$0xff]  ;;  %s102_s2 = sshll.u32 %s210_s0, 4  ;;  %s103_s2 = int_to_ptr.vmem [resolvable:$true] %s102_s2 }
  0x10   :  { %80 = vmatpush.msra.mxu0 %v65_v3  ;;  %v56_v12 = vld [vmem:[#allocation2 + $0x10] sm:$0xff]  ;;  %v55_v13 = vld [vmem:[#allocation2 + $0x8] sm:$0xff]  ;;  %v54_v14 = vld [vmem:[#allocation2] sm:$0xff] }
  0x11   :  { %v67_v20 = vld [vmem:[#allocation5] sm:$0xff] }
  0x12   :  { %81 = vmatpush.msra.mxu0 %v64_v4 }
  0x14   :  { %82 = vmatpush.msra.mxu0 %v63_v5 }
  0x16   :  { %83 = vmatpush.msra.mxu0 %v62_v6 }
  0x18   :  { %84 = vmatpush.msra.mxu0 %v61_v7 }
  0x1a   :  { %85 = vmatpush.msra.mxu0 %v60_v8 }
  0x1c   :  { %86 = vmatpush.msra.mxu0 %v59_v9 }
  0x1e   :  { %87 = vmatpush.msra.mxu0 %v58_v10 }
  0x20   :  { %88 = vmatpush.msra.mxu0 %v57_v11 }
  0x22   :  { %89 = vmatpush.msra.mxu0 %v56_v12 }
  0x24   :  { %90 = vmatpush.msra.mxu0 %v55_v13 }
  0x26   :  { %91 = vmatpush.msra.mxu0 %v54_v14 }
  0x80   :  { %v50_v17 = vpop.permute.xlu0 %49 }
  0x81   :  { %vm51_vm2 = vcmp.eq.s32.totalorder %v47_v16, %v50_v17 }
  0x82   :  { %v115_v19 = vsel %vm51_vm2, 1.0, %v209_v18 }
  0x83   :  { %117 = vmatmul.msk.f32.vlgmr.msra.gmra.mxu0 %vm68_vm1, %v115_v19 }
 0x100   :  { %v93_v21 = vpop.f32.mrf.mxu0 }
 0x101   :  { %v94_v22 = vadd.f32 %v93_v21, %v67_v20 }
 0x103   :  { %96 = vst [vmem:[#allocation7] sm:$0xff] %v94_v22 }
 0x104   :  { %107 = dma.vmem_to_hbm [thread:$0]  %s103_s2, 128, %s105_s27, [#allocation4]  }
 0x105   :  { %202 = dma.done.wait [#allocation4], 128  }
 0x106   :  { %203 = vsyncadd [#allocation4], 4294967168 }
 0x107   :  { %112 = vsyncpa [#allocation3], 1 }
 0x108   :  { %113 = vsyncpa [#allocation6], 1 }
 0x109   :  { %114 = vsyncpa [#allocation4], 1 }

</bundles_post_ra>
